<compile_context>
chip_gen: v7x
topology: tpu7x:2x2x1
jax: 0.10.0
libtpu: 0.0.40
codegen_flags: <defaults>
</compile_context>

<pallas_src>
import functools
import math

import jax
import jax.numpy as jnp
from jax.experimental import pallas as pl
from jax.experimental.pallas import tpu as pltpu

BN_EPS = 1e-5
VIRTUAL_BATCH_SIZE = 128


def _ghost_batch_norm(h, inv_n):
    """Training-mode BN over axis 1 of [groups, chunk, F] (gamma=1, beta=0)."""
    s = jnp.sum(h, axis=1, keepdims=True)
    ss = jnp.sum(h * h, axis=1, keepdims=True)
    mean = s * inv_n
    var = jnp.maximum(ss * inv_n - mean * mean, 0.0)   # clamp tiny negative rounding
    return (h - mean) * jax.lax.rsqrt(var + jnp.float32(BN_EPS))


def glu_block_kernel(x_ref, w0_ref, w1_ref, o_ref, *,
                     chunk, n_groups, d_pad, compute_dtype):
    scale = jnp.float32(math.sqrt(0.5))
    inv_n = jnp.float32(1.0 / chunk)
    rows = chunk * n_groups

    x = x_ref[...].astype(jnp.float32)                 # [rows, d_pad], f32

    def glu_layer(x, w_ref):
        xc = x.astype(compute_dtype)                   # bf16 (or f32) MXU operand
        # One fused dot; columns [0, d_pad) are the "a" half, [d_pad, 2*d_pad) the gate.
        h = jnp.dot(xc, w_ref[...], preferred_element_type=jnp.float32)
        # Per-128-row ghost-BN groups: layout-preserving reshape (chunk % 8 == 0),
        # reduce over axis 1 -- no per-group slices / concatenate copies.
        hn = _ghost_batch_norm(h.reshape(n_groups, chunk, 2 * d_pad), inv_n)
        a = hn[:, :, :d_pad]                           # lane-aligned split at d_pad
        g = hn[:, :, d_pad:]
        glu = (a * jax.nn.sigmoid(g)).reshape(rows, d_pad)
        return (x + glu) * scale                       # residual (first=False)

    x = glu_layer(x, w0_ref)                           # GLU layer 0
    x = glu_layer(x, w1_ref)                           # GLU layer 1
    o_ref[...] = x.astype(o_ref.dtype)


def _pick_chunks_per_tile(n_chunks, max_chunks_per_tile):
    """Largest divisor of n_chunks <= max, preferring an even grid of >= 2 tiles."""
    cap = max(1, min(max_chunks_per_tile, n_chunks))
    divisors = [d for d in range(1, cap + 1) if n_chunks % d == 0]
    even_grid = [d for d in divisors
                 if (n_chunks // d) >= 2 and (n_chunks // d) % 2 == 0]
    return max(even_grid) if even_grid else max(divisors)


def glu_block(x, w0, w1, *, virtual_batch_size=VIRTUAL_BATCH_SIZE,
              chunks_per_tile=8, compute_dtype=jnp.bfloat16,
              return_padded=False):
    """GLUBlock(first=False, n_glu=2) forward.

    x        : [B, D] float32
    w0, w1   : PyTorch-layout nn.Linear weights, shape [2*D, D] (bias=False)
    """
    B, D = x.shape
    assert w0.shape == (2 * D, D) and w1.shape == (2 * D, D)

    # --- ghost-BN chunking (torch.chunk with equal chunk sizes) ---
    n_chunks = -(-B // virtual_batch_size)             # ceil(B / vbs)
    assert B % n_chunks == 0, (
        "TODO(synk): ragged ghost-BN chunks (unequal torch.chunk) unsupported")
    chunk = B // n_chunks
    assert chunk % 8 == 0 or n_chunks == 1, "chunk rows must be sublane-aligned"

    cpt = _pick_chunks_per_tile(n_chunks, chunks_per_tile)
    n_tiles = n_chunks // cpt
    tile_rows = chunk * cpt                            # M rows per grid step

    # --- lane-dense padding of the feature axis (D -> multiple of 128) ---
    d_pad = -(-D // 128) * 128
    x_p = x if d_pad == D else jnp.pad(x, ((0, 0), (0, d_pad - D)))

    def prep_weight(w):
        # h = x @ w.T ; first D output features use w[:D] ("a"), last D use w[D:] (gate).
        pad = ((0, d_pad - D), (0, d_pad - D))
        wa = jnp.pad(w[:D, :].T, pad)                  # [d_pad, d_pad], zero pad is inert
        wg = jnp.pad(w[D:, :].T, pad)
        return jnp.concatenate([wa, wg], axis=1).astype(compute_dtype)  # [d_pad, 2*d_pad]

    w0f = prep_weight(w0)
    w1f = prep_weight(w1)

    # --- VMEM budgeting (v5e default scoped limit 16 MiB; v7x physical 64 MiB) ---
    w_bytes = d_pad * 2 * d_pad * jnp.dtype(compute_dtype).itemsize
    single_buffer_weights = (2 * 2 * w_bytes) > (8 << 20)   # double-buffered weights > 8 MiB
    w_bufs = 1 if single_buffer_weights else 2
    slab = tile_rows * d_pad * 4                       # one f32 [tile_rows, d_pad] slab
    vmem_est = 2 * 2 * slab + 2 * w_bufs * w_bytes + 12 * slab
    try:
        vmem_cap = int(pltpu.get_tpu_info().vmem_capacity_bytes)
    except Exception:                                  # fall back to v7x-safe ceiling
        vmem_cap = 64 << 20
    vmem_limit = int(min(max(int(vmem_est * 1.25), 32 << 20), int(vmem_cap * 0.75)))

    if single_buffer_weights:
        # Resident weights: constant index_map, no need for a second buffer.
        w_spec = pl.BlockSpec((d_pad, 2 * d_pad), lambda i: (0, 0),
                              pipeline_mode=pl.Buffered(1))
    else:
        w_spec = pl.BlockSpec((d_pad, 2 * d_pad), lambda i: (0, 0))
    x_spec = pl.BlockSpec((tile_rows, d_pad), lambda i: (i, 0))

    kernel = functools.partial(glu_block_kernel, chunk=chunk, n_groups=cpt,
                               d_pad=d_pad, compute_dtype=compute_dtype)

    out = pl.pallas_call(
        kernel,
        out_shape=jax.ShapeDtypeStruct((B, d_pad), jnp.float32),
        grid=(n_tiles,),
        in_specs=[x_spec, w_spec, w_spec],
        out_specs=pl.BlockSpec((tile_rows, d_pad), lambda i: (i, 0)),
        compiler_params=pltpu.CompilerParams(
            dimension_semantics=("parallel",),         # shard row tiles across v7x TCs
            vmem_limit_bytes=vmem_limit,
        ),
    )(x_p, w0f, w1f)

    # Slicing back to [B, D] costs an extra HBM read+write; callers that can
    # consume the padded slab should pass return_padded=True.
    return out if return_padded else out[:, :D]


def init_glu_weight(key, input_dim, output_dim2):
    """xavier_normal_ with TabNet's gain; PyTorch layout [out, in]."""
    gain = math.sqrt((input_dim + output_dim2) / math.sqrt(input_dim))
    std = gain * math.sqrt(2.0 / (input_dim + output_dim2))
    return std * jax.random.normal(key, (output_dim2, input_dim), dtype=jnp.float32)


def reference_glu_block(x, w0, w1, virtual_batch_size=VIRTUAL_BATCH_SIZE):
    """Pure-JAX (f32) reference of the same forward pass."""
    B, D = x.shape
    scale = math.sqrt(0.5)
    n_chunks = -(-B // virtual_batch_size)
    for w in (w0, w1):
        h = x @ w.T
        normed = []
        for hc in jnp.split(h, n_chunks, axis=0):
            mean = jnp.mean(hc, axis=0, keepdims=True)
            var = jnp.mean((hc - mean) ** 2, axis=0, keepdims=True)
            normed.append((hc - mean) / jnp.sqrt(var + BN_EPS))
        h = jnp.concatenate(normed, axis=0)
        y = h[:, :D] * jax.nn.sigmoid(h[:, D:])
        x = (x + y) * scale
    return x


if __name__ == "__main__":
    # GLUBlock(input_dim=32, output_dim=32, n_glu=2, first=False)
    D = 32
    key = jax.random.PRNGKey(0)
    kx, k0, k1 = jax.random.split(key, 3)

    w0 = init_glu_weight(k0, D, 2 * D)   # layer 0: input_dim  -> 2*output_dim
    w1 = init_glu_weight(k1, D, 2 * D)   # layer 1: output_dim -> 2*output_dim

    # Case 1: tiny batch (single ghost-BN chunk), f32 matmul path, tight check.
    x_small = jax.random.normal(kx, (8, D), dtype=jnp.float32)
    out_s = jax.block_until_ready(glu_block(x_small, w0, w1, compute_dtype=jnp.float32))
    ref_s = reference_glu_block(x_small, w0, w1)
    assert out_s.shape == (8, D)
    assert jnp.allclose(out_s, ref_s, atol=1e-4, rtol=1e-4), "f32 path mismatch"

    # Case 2: multi-chunk ghost BN: B=1024 -> 8 chunks of 128; chunks_per_tile picks
    # 4 chunks/tile (tile_rows=512) so the grid is an even 2 tiles ("parallel" axis
    # covers both v7x TCs); fused N=256 matmul, bf16 MXU path, relaxed check.
    x_big = jax.random.normal(kx, (1024, D), dtype=jnp.float32)
    out_b = jax.block_until_ready(glu_block(x_big, w0, w1, compute_dtype=jnp.bfloat16))
    ref_b = reference_glu_block(x_big, w0, w1)
    assert out_b.shape == (1024, D)
    assert jnp.allclose(out_b, ref_b, atol=5e-2, rtol=5e-2), "bf16 path mismatch"

    print("KERNEL_OK")
</pallas_src>

<mosaic_0001>
module attributes {stable_mosaic.version = 11 : i64} {
  func.func @glu_block_kernel(%arg0: i32, %arg1: memref<8x128xf32, #tpu.memory_space<vmem>>, %arg2: memref<128x256xf32, #tpu.memory_space<vmem>>, %arg3: memref<128x256xf32, #tpu.memory_space<vmem>>, %arg4: memref<8x128xf32, #tpu.memory_space<vmem>>) attributes {dimension_semantics = [#tpu.dimension_semantics<parallel>], iteration_bounds = array<i64: 1>, scalar_prefetch = 0 : i64, scratch_operands = 0 : i64, tpu.core_type = #tpu.core_type<tc>, window_params = [{transform_indices = @transform_0, window_bounds = array<i64: 8, 128>}, {pipeline_mode = #tpu.pipeline_mode<synchronous>, transform_indices = @transform_1, window_bounds = array<i64: 128, 256>}, {pipeline_mode = #tpu.pipeline_mode<synchronous>, transform_indices = @transform_2, window_bounds = array<i64: 128, 256>}, {transform_indices = @transform_3, window_bounds = array<i64: 8, 128>}]} {
    %c0 = arith.constant 0 : index
    %c0_0 = arith.constant 0 : index
    %0 = vector.load %arg1[%c0, %c0_0] : memref<8x128xf32, #tpu.memory_space<vmem>>, vector<8x128xf32>
    %c0_1 = arith.constant 0 : index
    %c0_2 = arith.constant 0 : index
    %1 = vector.load %arg2[%c0_1, %c0_2] : memref<128x256xf32, #tpu.memory_space<vmem>>, vector<128x256xf32>
    %cst = arith.constant dense<0.000000e+00> : vector<8x256xf32>
    %2 = tpu.matmul %0, %1, %cst {dimension_numbers = #tpu.dot_dimension_numbers<[1], [0], [0], [1], [0, 0, 1, 1], [], []>} : vector<8x128xf32>, vector<128x256xf32>, vector<8x256xf32> -> vector<8x256xf32>
    %3 = vector.shape_cast %2 : vector<8x256xf32> to vector<1x8x256xf32>
    %cst_3 = arith.constant dense<0.000000e+00> : vector<1x256xf32>
    %4 = vector.multi_reduction <add>, %3, %cst_3 [1] : vector<1x8x256xf32> to vector<1x256xf32>
    %5 = vector.shape_cast %4 : vector<1x256xf32> to vector<1x1x256xf32>
    %6 = arith.mulf %3, %3 : vector<1x8x256xf32>
    %cst_4 = arith.constant dense<0.000000e+00> : vector<1x256xf32>
    %7 = vector.multi_reduction <add>, %6, %cst_4 [1] : vector<1x8x256xf32> to vector<1x256xf32>
    %8 = vector.shape_cast %7 : vector<1x256xf32> to vector<1x1x256xf32>
    %cst_5 = arith.constant 1.250000e-01 : f32
    %9 = vector.broadcast %cst_5 : f32 to vector<1x1x256xf32>
    %10 = arith.mulf %5, %9 : vector<1x1x256xf32>
    %cst_6 = arith.constant 1.250000e-01 : f32
    %11 = vector.broadcast %cst_6 : f32 to vector<1x1x256xf32>
    %12 = arith.mulf %8, %11 : vector<1x1x256xf32>
    %13 = arith.mulf %10, %10 : vector<1x1x256xf32>
    %14 = arith.subf %12, %13 : vector<1x1x256xf32>
    %cst_7 = arith.constant 0.000000e+00 : f32
    %15 = vector.broadcast %cst_7 : f32 to vector<1x1x256xf32>
    %16 = arith.maximumf %14, %15 : vector<1x1x256xf32>
    %17 = vector.broadcast %10 : vector<1x1x256xf32> to vector<1x8x256xf32>
    %18 = arith.subf %3, %17 : vector<1x8x256xf32>
    %cst_8 = arith.constant 9.99999974E-6 : f32
    %19 = vector.broadcast %cst_8 : f32 to vector<1x1x256xf32>
    %20 = arith.addf %16, %19 : vector<1x1x256xf32>
    %21 = math.rsqrt %20 : vector<1x1x256xf32>
    %22 = vector.broadcast %21 : vector<1x1x256xf32> to vector<1x8x256xf32>
    %23 = arith.mulf %18, %22 : vector<1x8x256xf32>
    %24 = vector.extract_strided_slice %23 {offsets = [0, 0, 0], sizes = [1, 8, 128], strides = [1, 1, 1]} : vector<1x8x256xf32> to vector<1x8x128xf32>
    %25 = vector.extract_strided_slice %23 {offsets = [0, 0, 128], sizes = [1, 8, 128], strides = [1, 1, 1]} : vector<1x8x256xf32> to vector<1x8x128xf32>
    %26 = arith.negf %25 : vector<1x8x128xf32>
    %27 = math.exp %26 : vector<1x8x128xf32>
    %cst_9 = arith.constant 1.000000e+00 : f32
    %28 = vector.broadcast %cst_9 : f32 to vector<1x8x128xf32>
    %29 = arith.addf %28, %27 : vector<1x8x128xf32>
    %30 = arith.divf %28, %29 : vector<1x8x128xf32>
    %31 = arith.mulf %24, %30 : vector<1x8x128xf32>
    %32 = vector.shape_cast %31 : vector<1x8x128xf32> to vector<8x128xf32>
    %33 = arith.addf %0, %32 : vector<8x128xf32>
    %cst_10 = arith.constant 0.707106769 : f32
    %34 = vector.broadcast %cst_10 : f32 to vector<8x128xf32>
    %35 = arith.mulf %33, %34 : vector<8x128xf32>
    %c0_11 = arith.constant 0 : index
    %c0_12 = arith.constant 0 : index
    %36 = vector.load %arg3[%c0_11, %c0_12] : memref<128x256xf32, #tpu.memory_space<vmem>>, vector<128x256xf32>
    %cst_13 = arith.constant dense<0.000000e+00> : vector<8x256xf32>
    %37 = tpu.matmul %35, %36, %cst_13 {dimension_numbers = #tpu.dot_dimension_numbers<[1], [0], [0], [1], [0, 0, 1, 1], [], []>} : vector<8x128xf32>, vector<128x256xf32>, vector<8x256xf32> -> vector<8x256xf32>
    %38 = vector.shape_cast %37 : vector<8x256xf32> to vector<1x8x256xf32>
    %cst_14 = arith.constant dense<0.000000e+00> : vector<1x256xf32>
    %39 = vector.multi_reduction <add>, %38, %cst_14 [1] : vector<1x8x256xf32> to vector<1x256xf32>
    %40 = vector.shape_cast %39 : vector<1x256xf32> to vector<1x1x256xf32>
    %41 = arith.mulf %38, %38 : vector<1x8x256xf32>
    %cst_15 = arith.constant dense<0.000000e+00> : vector<1x256xf32>
    %42 = vector.multi_reduction <add>, %41, %cst_15 [1] : vector<1x8x256xf32> to vector<1x256xf32>
    %43 = vector.shape_cast %42 : vector<1x256xf32> to vector<1x1x256xf32>
    %cst_16 = arith.constant 1.250000e-01 : f32
    %44 = vector.broadcast %cst_16 : f32 to vector<1x1x256xf32>
    %45 = arith.mulf %40, %44 : vector<1x1x256xf32>
    %cst_17 = arith.constant 1.250000e-01 : f32
    %46 = vector.broadcast %cst_17 : f32 to vector<1x1x256xf32>
    %47 = arith.mulf %43, %46 : vector<1x1x256xf32>
    %48 = arith.mulf %45, %45 : vector<1x1x256xf32>
    %49 = arith.subf %47, %48 : vector<1x1x256xf32>
    %cst_18 = arith.constant 0.000000e+00 : f32
    %50 = vector.broadcast %cst_18 : f32 to vector<1x1x256xf32>
    %51 = arith.maximumf %49, %50 : vector<1x1x256xf32>
    %52 = vector.broadcast %45 : vector<1x1x256xf32> to vector<1x8x256xf32>
    %53 = arith.subf %38, %52 : vector<1x8x256xf32>
    %cst_19 = arith.constant 9.99999974E-6 : f32
    %54 = vector.broadcast %cst_19 : f32 to vector<1x1x256xf32>
    %55 = arith.addf %51, %54 : vector<1x1x256xf32>
    %56 = math.rsqrt %55 : vector<1x1x256xf32>
    %57 = vector.broadcast %56 : vector<1x1x256xf32> to vector<1x8x256xf32>
    %58 = arith.mulf %53, %57 : vector<1x8x256xf32>
    %59 = vector.extract_strided_slice %58 {offsets = [0, 0, 0], sizes = [1, 8, 128], strides = [1, 1, 1]} : vector<1x8x256xf32> to vector<1x8x128xf32>
    %60 = vector.extract_strided_slice %58 {offsets = [0, 0, 128], sizes = [1, 8, 128], strides = [1, 1, 1]} : vector<1x8x256xf32> to vector<1x8x128xf32>
    %61 = arith.negf %60 : vector<1x8x128xf32>
    %62 = math.exp %61 : vector<1x8x128xf32>
    %cst_20 = arith.constant 1.000000e+00 : f32
    %63 = vector.broadcast %cst_20 : f32 to vector<1x8x128xf32>
    %64 = arith.addf %63, %62 : vector<1x8x128xf32>
    %65 = arith.divf %63, %64 : vector<1x8x128xf32>
    %66 = arith.mulf %59, %65 : vector<1x8x128xf32>
    %67 = vector.shape_cast %66 : vector<1x8x128xf32> to vector<8x128xf32>
    %68 = arith.addf %35, %67 : vector<8x128xf32>
    %cst_21 = arith.constant 0.707106769 : f32
    %69 = vector.broadcast %cst_21 : f32 to vector<8x128xf32>
    %70 = arith.mulf %68, %69 : vector<8x128xf32>
    %c0_22 = arith.constant 0 : index
    %c0_23 = arith.constant 0 : index
    %71 = vector.load %arg4[%c0_22, %c0_23] : memref<8x128xf32, #tpu.memory_space<vmem>>, vector<8x128xf32>
    tpu.vector_store %arg4[%c0_22, %c0_23], %70 {strides = array<i32>} : memref<8x128xf32, #tpu.memory_space<vmem>>, vector<8x128xf32>,
    return
  }
  func.func @transform_0(%arg0: i32) -> (i32, i32) {
    %c0_i32 = arith.constant 0 : i32
    %c0_i32_0 = arith.constant 0 : i32
    return %arg0, %c0_i32 : i32, i32
  }
  func.func @transform_1(%arg0: i32) -> (i32, i32) {
    %c0_i32 = arith.constant 0 : i32
    %c0_i32_0 = arith.constant 0 : i32
    %c0_i32_1 = arith.constant 0 : i32
    return %c0_i32, %c0_i32_0 : i32, i32
  }
  func.func @transform_2(%arg0: i32) -> (i32, i32) {
    %c0_i32 = arith.constant 0 : i32
    %c0_i32_0 = arith.constant 0 : i32
    %c0_i32_1 = arith.constant 0 : i32
    return %c0_i32, %c0_i32_0 : i32, i32
  }
  func.func @transform_3(%arg0: i32) -> (i32, i32) {
    %c0_i32 = arith.constant 0 : i32
    %c0_i32_0 = arith.constant 0 : i32
    return %arg0, %c0_i32 : i32, i32
  }
}

</mosaic_0001>

<bundles_post_ra>
// kernel: tpu_custom_call.1
= control target key start
LH: loop header
LB: loop body
LE: loop exit
PB: predicated region body
PF: predicated region fallthrough
CT: control target
= control target key end

     0   :  { %8 = vsyncpa [#allocation3], 0  ;;  %s652_s0 = inlined_call_operand.hbm [shape: f32[8,128], index: 0, kind: input, shape index: {}]   ;;  %s653_s1 = inlined_call_operand.hbm [shape: f32[128,256], index: 1, kind: input, shape index: {}]   ;;  %s654_s2 = inlined_call_operand.hbm [shape: f32[128,256], index: 2, kind: input, shape index: {}]   ;;  %s655_s3 = inlined_call_operand.hbm [shape: f32[8,128], index: 3, kind: output, shape index: {}]  }
   0x1   :  { %9 = vsyncpa [#allocation6], 0 }
   0x2   :  { %10 = vsyncpa [#allocation4], 0  ;;  %s567_s12 = smov [#allocation5]   ;;  %s473_s16 = scalar_lea.hbm %s653_s1, 4096 }
   0x3   :  { %s26_s13 = sshll.u32 %s567_s12, 4  ;;  %p474_p0 = scmp.ne.s32.totalorder %s653_s1, %s473_s16  ;;  %s27_s13 = int_to_ptr.vmem [resolvable:$true] %s26_s13 }
   0x4   :  { %p477_p1 = scmp.lt.u32.totalorder %s473_s16, %s653_s1 }
   0x6   :  { %p479_p2 = pnand %p477_p1, %p474_p0 }
   0x8   :  { %482 = shalt.err (!%p479_p2)
}
   0x9   :  { %s483_s21 = scalar_lea.vmem %s27_s13, 4096  ;;  %p488_p4 = scmp.lt.s32.totalorder %s27_s13, %s27_s13 }
   0xa   :  { %p484_p3 = scmp.ne.s32.totalorder %s27_s13, %s483_s21  ;;  %p489_p5 = scmp.lt.s32.totalorder %s483_s21, %s483_s21 }
   0xc   :  { %p490_p6 = por %p489_p5, %p488_p4 }
   0xe   :  { %p491_p7 = pnand %p490_p6, %p484_p3 }
  0x10   :  { %494 = shalt.err (!%p491_p7)
}
  0x11   :  { %s568_s22 = smov 256   ;;  %s569_s23 = smov 16  }
  0x12   :  { %32 = dma.hbm_to_vmem [thread:$0]  %s653_s1, 4096, %s27_s13, [#allocation6], %s568_s22, %s568_s22, %s569_s23  }
  0x13   :  { %s570_s26 = smov [#allocation2]   ;;  %s571_s28 = smov [#allocation7]  }
  0x14   :  { %s17_s27 = sshll.u32 %s570_s26, 4  ;;  %s38_s29 = sshll.u32 %s571_s28, 4  ;;  %s18_s27 = int_to_ptr.vmem [resolvable:$true] %s17_s27  ;;  %s39_s29 = int_to_ptr.vmem [resolvable:$true] %s38_s29 }
  0x15   :  { %s495_s5 = scalar_lea.hbm %s652_s0, 128 }
  0x16   :  { %p496_p8 = scmp.ne.s32.totalorder %s652_s0, %s495_s5  ;;  %p499_p9 = scmp.lt.u32.totalorder %s495_s5, %s652_s0 }
  0x18   :  { %p501_p10 = pnand %p499_p9, %p496_p8 }
  0x1a   :  { %504 = shalt.err (!%p501_p10)
}
  0x1b   :  { %s505_s1 = scalar_lea.vmem %s18_s27, 128  ;;  %p510_p12 = scmp.lt.s32.totalorder %s18_s27, %s18_s27 }
  0x1c   :  { %p506_p11 = scmp.ne.s32.totalorder %s18_s27, %s505_s1  ;;  %p511_p13 = scmp.lt.s32.totalorder %s505_s1, %s505_s1 }
  0x1e   :  { %p512_p0 = por %p511_p13, %p510_p12 }
  0x20   :  { %p513_p1 = pnand %p512_p0, %p506_p11 }
  0x22   :  { %516 = shalt.err (!%p513_p1)
}
  0x23   :  { %20 = dma.hbm_to_vmem [thread:$0]  %s652_s0, 128, %s18_s27, [#allocation3]  }
  0x24   :  { %s517_s14 = scalar_lea.hbm %s654_s2, 4096 }
  0x25   :  { %p518_p2 = scmp.ne.s32.totalorder %s654_s2, %s517_s14  ;;  %p521_p3 = scmp.lt.u32.totalorder %s517_s14, %s654_s2 }
  0x27   :  { %p523_p4 = pnand %p521_p3, %p518_p2 }
  0x29   :  { %526 = shalt.err (!%p523_p4)
}
  0x2a   :  { %s527_s19 = scalar_lea.vmem %s39_s29, 4096  ;;  %p532_p6 = scmp.lt.s32.totalorder %s39_s29, %s39_s29 }
  0x2b   :  { %p528_p5 = scmp.ne.s32.totalorder %s39_s29, %s527_s19  ;;  %p533_p7 = scmp.lt.s32.totalorder %s527_s19, %s527_s19 }
  0x2d   :  { %p534_p8 = por %p533_p7, %p532_p6 }
  0x2f   :  { %p535_p9 = pnand %p534_p8, %p528_p5 }
  0x31   :  { %538 = shalt.err (!%p535_p9)
}
  0x32   :  { %44 = dma.hbm_to_vmem [thread:$0]  %s654_s2, 4096, %s39_s29, [#allocation6], %s568_s22, %s568_s22, %s569_s23  }
  0x33   :  { %561 = dma.done.wait [#allocation3], 128  }
  0x34   :  { %562 = vsyncadd [#allocation3], 4294967168 }
  0x35   :  { %563 = dma.done.wait [#allocation6], 8192  }
  0x36   :  { %564 = vsyncadd [#allocation6], 4294959104  ;;  %v572_v0 = vmov 0.0   ;;  %v56_v1 = vld [vmem:[#allocation5 + $0x8] sm:$0xff]  ;;  %v58_v2 = vld [vmem:[#allocation5 + $0x18] sm:$0xff]  ;;  %s573_s2 = smov [#allocation8]  }
  0x37   :  { %151 = vmatprep.mubr.f32.mxu0 %v572_v0  ;;  %307 = vmatprep.mubr.f32.mxu1 %v572_v0  ;;  %v55_v3 = vld [vmem:[#allocation5] sm:$0xff]  ;;  %v386_v4 = vpack.c.bf16 %v58_v2, %v56_v1  ;;  %v57_v5 = vld [vmem:[#allocation5 + $0x10] sm:$0xff]  ;;  %v60_v6 = vld [vmem:[#allocation5 + $0x28] sm:$0xff]  ;;  %s374_s21 = sshll.u32 %s573_s2, 4  ;;  %s375_s21 = int_to_ptr.vmem [resolvable:$true] %s374_s21 }
  0x38   :  { %v62_v7 = vld [vmem:[#allocation5 + $0x38] sm:$0xff]  ;;  %v388_v8 = vpack.c.bf16 %v57_v5, %v55_v3  ;;  %v59_v10 = vld [vmem:[#allocation5 + $0x20] sm:$0xff]  ;;  %v61_v11 = vld [vmem:[#allocation5 + $0x30] sm:$0xff]  ;;  %s539_s22 = scalar_lea.vmem %s375_s21, 128  ;;  %p544_p11 = scmp.lt.s32.totalorder %s375_s21, %s375_s21 }
  0x39   :  { %v390_v9 = vpack.c.bf16 %v62_v7, %v60_v6  ;;  %v64_v12 = vld [vmem:[#allocation5 + $0x48] sm:$0xff]  ;;  %387 = vmatprep.subr.bf16.mxu0 %v386_v4  ;;  %v66_v13 = vld [vmem:[#allocation5 + $0x58] sm:$0xff]  ;;  %v392_v14 = vpack.c.bf16 %v61_v11, %v59_v10  ;;  %v63_v16 = vld [vmem:[#allocation5 + $0x40] sm:$0xff]  ;;  %p540_p10 = scmp.ne.s32.totalorder %s375_s21, %s539_s22  ;;  %p545_p12 = scmp.lt.s32.totalorder %s539_s22, %s539_s22 }
  0x3a   :  { %389 = vmatpush1.bf16.msra.mxu0 %v388_v8  ;;  %v394_v15 = vpack.c.bf16 %v66_v13, %v64_v12  ;;  %v65_v17 = vld [vmem:[#allocation5 + $0x50] sm:$0xff]  ;;  %v68_v18 = vld [vmem:[#allocation5 + $0x68] sm:$0xff]  ;;  %v70_v19 = vld [vmem:[#allocation5 + $0x78] sm:$0xff] }
  0x3b   :  { %391 = vmatprep.subr.bf16.mxu0 %v390_v9  ;;  %v396_v20 = vpack.c.bf16 %v65_v17, %v63_v16  ;;  %v398_v21 = vpack.c.bf16 %v70_v19, %v68_v18  ;;  %v67_v22 = vld [vmem:[#allocation5 + $0x60] sm:$0xff]  ;;  %v69_v23 = vld [vmem:[#allocation5 + $0x70] sm:$0xff]  ;;  %v72_v24 = vld [vmem:[#allocation5 + $0x88] sm:$0xff]  ;;  %p546_p13 = por %p545_p12, %p544_p11 }
  0x3c   :  { %v74_v25 = vld [vmem:[#allocation5 + $0x98] sm:$0xff]  ;;  %v400_v26 = vpack.c.bf16 %v69_v23, %v67_v22  ;;  %v71_v28 = vld [vmem:[#allocation5 + $0x80] sm:$0xff]  ;;  %v73_v29 = vld [vmem:[#allocation5 + $0x90] sm:$0xff] }
  0x3d   :  { %v402_v27 = vpack.c.bf16 %v74_v25, %v72_v24  ;;  %v76_v30 = vld [vmem:[#allocation5 + $0xa8] sm:$0xff]  ;;  %v78_v31 = vld [vmem:[#allocation5 + $0xb8] sm:$0xff]  ;;  %v404_v32 = vpack.c.bf16 %v73_v29, %v71_v28  ;;  %v75_v34 = vld [vmem:[#allocation5 + $0xa0] sm:$0xff]  ;;  %p547_p0 = pnand %p546_p13, %p540_p10 }
  0x3e   :  { %393 = vmatpush1.bf16.msra.mxu0 %v392_v14  ;;  %v406_v33 = vpack.c.bf16 %v78_v31, %v76_v30  ;;  %v77_v35 = vld [vmem:[#allocation5 + $0xb0] sm:$0xff]  ;;  %v80_v36 = vld [vmem:[#allocation5 + $0xc8] sm:$0xff]  ;;  %v82_v37 = vld [vmem:[#allocation5 + $0xd8] sm:$0xff] }
  0x3f   :  { %395 = vmatprep.subr.bf16.mxu0 %v394_v15  ;;  %v408_v38 = vpack.c.bf16 %v77_v35, %v75_v34  ;;  %v410_v39 = vpack.c.bf16 %v82_v37, %v80_v36  ;;  %v79_v40 = vld [vmem:[#allocation5 + $0xc0] sm:$0xff]  ;;  %v81_v41 = vld [vmem:[#allocation5 + $0xd0] sm:$0xff]  ;;  %v84_v42 = vld [vmem:[#allocation5 + $0xe8] sm:$0xff] }
  0x40   :  { %v86_v43 = vld [vmem:[#allocation5 + $0xf8] sm:$0xff]  ;;  %v412_v44 = vpack.c.bf16 %v81_v41, %v79_v40  ;;  %v83_v46 = vld [vmem:[#allocation5 + $0xe0] sm:$0xff]  ;;  %v85_v47 = vld [vmem:[#allocation5 + $0xf0] sm:$0xff] }
  0x41   :  { %v414_v45 = vpack.c.bf16 %v86_v43, %v84_v42  ;;  %v416_v48 = vpack.c.bf16 %v85_v47, %v83_v46  ;;  %v636_v49 = vld [vmem:[#allocation2] sm:$0xff]  ;;  %v212_v50 = vld [vmem:[#allocation7 + $0x8] sm:$0xff]  ;;  %v211_v53 = vld [vmem:[#allocation7] sm:$0xff] }
  0x42   :  { %397 = vmatpush1.bf16.msra.mxu0 %v396_v20  ;;  %v214_v51 = vld [vmem:[#allocation7 + $0x18] sm:$0xff]  ;;  %v213_v54 = vld [vmem:[#allocation7 + $0x10] sm:$0xff]  ;;  %v216_v56 = vld [vmem:[#allocation7 + $0x28] sm:$0xff] }
  0x43   :  { %399 = vmatprep.subr.bf16.mxu0 %v398_v21  ;;  %v418_v52 = vpack.c.bf16 %v214_v51, %v212_v50  ;;  %v420_v55 = vpack.c.bf16 %v213_v54, %v211_v53  ;;  %v218_v57 = vld [vmem:[#allocation7 + $0x38] sm:$0xff]  ;;  %v215_v59 = vld [vmem:[#allocation7 + $0x20] sm:$0xff]  ;;  %v217_v60 = vld [vmem:[#allocation7 + $0x30] sm:$0xff] }
  0x44   :  { %v422_v58 = vpack.c.bf16 %v218_v57, %v216_v56  ;;  %v424_v61 = vpack.c.bf16 %v217_v60, %v215_v59  ;;  %v220_v62 = vld [vmem:[#allocation7 + $0x48] sm:$0xff]  ;;  %v222_v63 = vld [vmem:[#allocation7 + $0x58] sm:$0xff]  ;;  %v219_v1 = vld [vmem:[#allocation7 + $0x40] sm:$0xff] }
  0x45   :  { %419 = vmatprep.subr.bf16.mxu1 %v418_v52  ;;  %v426_v0 = vpack.c.bf16 %v222_v63, %v220_v62  ;;  %v221_v2 = vld [vmem:[#allocation7 + $0x50] sm:$0xff]  ;;  %v224_v4 = vld [vmem:[#allocation7 + $0x68] sm:$0xff]  ;;  %v226_v5 = vld [vmem:[#allocation7 + $0x78] sm:$0xff] }
  0x46   :  { %401 = vmatpush1.bf16.msra.mxu0 %v400_v26  ;;  %421 = vmatpush1.bf16.msra.mxu1 %v420_v55  ;;  %v428_v3 = vpack.c.bf16 %v221_v2, %v219_v1  ;;  %v430_v6 = vpack.c.bf16 %v226_v5, %v224_v4  ;;  %v223_v7 = vld [vmem:[#allocation7 + $0x60] sm:$0xff]  ;;  %v225_v8 = vld [vmem:[#allocation7 + $0x70] sm:$0xff]  ;;  %v228_v10 = vld [vmem:[#allocation7 + $0x88] sm:$0xff] }
  0x47   :  { %403 = vmatprep.subr.bf16.mxu0 %v402_v27  ;;  %423 = vmatprep.subr.bf16.mxu1 %v422_v58  ;;  %v432_v9 = vpack.c.bf16 %v225_v8, %v223_v7  ;;  %v230_v11 = vld [vmem:[#allocation7 + $0x98] sm:$0xff]  ;;  %v227_v13 = vld [vmem:[#allocation7 + $0x80] sm:$0xff]  ;;  %v229_v14 = vld [vmem:[#allocation7 + $0x90] sm:$0xff] }
  0x48   :  { %v434_v12 = vpack.c.bf16 %v230_v11, %v228_v10  ;;  %v436_v15 = vpack.c.bf16 %v229_v14, %v227_v13  ;;  %v232_v16 = vld [vmem:[#allocation7 + $0xa8] sm:$0xff]  ;;  %v234_v17 = vld [vmem:[#allocation7 + $0xb8] sm:$0xff]  ;;  %v231_v18 = vld [vmem:[#allocation7 + $0xa0] sm:$0xff] }
  0x49   :  { %v438_v19 = vpack.c.bf16 %v234_v17, %v232_v16  ;;  %v233_v20 = vld [vmem:[#allocation7 + $0xb0] sm:$0xff]  ;;  %v236_v21 = vld [vmem:[#allocation7 + $0xc8] sm:$0xff]  ;;  %v238_v22 = vld [vmem:[#allocation7 + $0xd8] sm:$0xff] }
  0x4a   :  { %405 = vmatpush1.bf16.msra.mxu0 %v404_v32  ;;  %425 = vmatpush1.bf16.msra.mxu1 %v424_v61  ;;  %v440_v23 = vpack.c.bf16 %v233_v20, %v231_v18  ;;  %v442_v24 = vpack.c.bf16 %v238_v22, %v236_v21  ;;  %v235_v25 = vld [vmem:[#allocation7 + $0xc0] sm:$0xff]  ;;  %v237_v26 = vld [vmem:[#allocation7 + $0xd0] sm:$0xff]  ;;  %v240_v27 = vld [vmem:[#allocation7 + $0xe8] sm:$0xff] }
  0x4b   :  { %407 = vmatprep.subr.bf16.mxu0 %v406_v33  ;;  %427 = vmatprep.subr.bf16.mxu1 %v426_v0  ;;  %v242_v28 = vld [vmem:[#allocation7 + $0xf8] sm:$0xff]  ;;  %v444_v29 = vpack.c.bf16 %v237_v26, %v235_v25  ;;  %v239_v31 = vld [vmem:[#allocation7 + $0xe0] sm:$0xff]  ;;  %v241_v32 = vld [vmem:[#allocation7 + $0xf0] sm:$0xff] }
  0x4c   :  { %v446_v30 = vpack.c.bf16 %v242_v28, %v240_v27  ;;  %v448_v33 = vpack.c.bf16 %v241_v32, %v239_v31 }
  0x4e   :  { %409 = vmatpush1.bf16.msra.mxu0 %v408_v38  ;;  %429 = vmatpush1.bf16.msra.mxu1 %v428_v3 }
  0x4f   :  { %411 = vmatprep.subr.bf16.mxu0 %v410_v39  ;;  %431 = vmatprep.subr.bf16.mxu1 %v430_v6 }
  0x52   :  { %413 = vmatpush1.bf16.msra.mxu0 %v412_v44  ;;  %433 = vmatpush1.bf16.msra.mxu1 %v432_v9 }
  0x53   :  { %415 = vmatprep.subr.bf16.mxu0 %v414_v45  ;;  %435 = vmatprep.subr.bf16.mxu1 %v434_v12 }
  0x56   :  { %417 = vmatpush1.bf16.msra.mxu0 %v416_v48  ;;  %437 = vmatpush1.bf16.msra.mxu1 %v436_v15 }
  0x57   :  { %439 = vmatprep.subr.bf16.mxu1 %v438_v19 }
  0x59   :  { %152 = vmatmul.mubr.f32.vlgmr.msra.gmra.mrb[0].mxu0 %v636_v49 }
  0x5a   :  { %441 = vmatpush1.bf16.msra.mxu1 %v440_v23 }
  0x5b   :  { %443 = vmatprep.subr.bf16.mxu1 %v442_v24 }
  0x5e   :  { %445 = vmatpush1.bf16.msra.mxu1 %v444_v29 }
  0x5f   :  { %447 = vmatprep.subr.bf16.mxu1 %v446_v30 }
  0x62   :  { %449 = vmatpush1.bf16.msra.mxu1 %v448_v33 }
 0x12c   :  { %v153_v34 = vpop.f32.mrb[0].mxu0 }
 0x12d   :  { %v155_v35 = vpop.f32.mrb[1].mxu0  ;;  %v158_v38 = vrot.slane %v153_v34, 4  ;;  %v170_v39 = vmul.f32 %v153_v34, %v153_v34 }
 0x12e   :  { %v164_v36 = vrot.slane %v155_v35, 4  ;;  %v171_v37 = vmul.f32 %v155_v35, %v155_v35 }
 0x12f   :  { %v159_v44 = vadd.f32 %v158_v38, %v153_v34  ;;  %v172_v45 = vrot.slane %v170_v39, 4 }
 0x130   :  { %v165_v40 = vadd.f32 %v164_v36, %v155_v35  ;;  %v178_v41 = vrot.slane %v171_v37, 4 }
 0x131   :  { %v160_v51 = vrot.slane %v159_v44, 2  ;;  %v173_v52 = vadd.f32 %v172_v45, %v170_v39 }
 0x132   :  { %v166_v42 = vrot.slane %v165_v40, 2  ;;  %v179_v43 = vadd.f32 %v178_v41, %v171_v37 }
 0x133   :  { %v161_v57 = vadd.f32 %v160_v51, %v159_v44  ;;  %v174_v58 = vrot.slane %v173_v52, 2 }
 0x134   :  { %v167_v46 = vadd.f32 %v166_v42, %v165_v40  ;;  %v180_v47 = vrot.slane %v179_v43, 2 }
 0x135   :  { %v162_v62 = vrot.slane %v161_v57, 1  ;;  %v175_v63 = vadd.f32 %v174_v58, %v173_v52 }
 0x136   :  { %v168_v48 = vrot.slane %v167_v46, 1  ;;  %v181_v50 = vadd.f32 %v180_v47, %v179_v43 }
 0x137   :  { %v163_v2 = vadd.f32 %v162_v62, %v161_v57  ;;  %v176_v3 = vrot.slane %v175_v63, 1 }
 0x138   :  { %v169_v53 = vadd.f32 %v168_v48, %v167_v46  ;;  %v182_v54 = vrot.slane %v181_v50, 1 }
 0x139   :  { %v177_v4 = vadd.f32 %v176_v3, %v175_v63  ;;  %v184_v5 = vmul.f32 0.125, %v163_v2 }
 0x13a   :  { %v183_v55 = vadd.f32 %v182_v54, %v181_v50  ;;  %v185_v56 = vmul.f32 0.125, %v169_v53 }
 0x13b   :  { %v186_v6 = vmul.f32 0.125, %v177_v4  ;;  %v188_v7 = vmul.f32 %v184_v5, %v184_v5  ;;  %v194_v18 = vsub.f32 %v153_v34, %v184_v5 }
 0x13c   :  { %v187_v59 = vmul.f32 0.125, %v183_v55  ;;  %v189_v60 = vmul.f32 %v185_v56, %v185_v56  ;;  %v195_v8 = vsub.f32 %v155_v35, %v185_v56 }
 0x13d   :  { %v190_v11 = vsub.f32 %v186_v6, %v188_v7 }
 0x13e   :  { %v191_v61 = vsub.f32 %v187_v59, %v189_v60 }
 0x13f   :  { %v192_v13 = vmax.f32 %v190_v11, 0.0 }
 0x140   :  { %v193_v0 = vmax.f32 %v191_v61, 0.0 }
 0x141   :  { %v196_v14 = vadd.f32 1e-05, %v192_v13 }
 0x142   :  { %v197_v1 = vadd.f32 1e-05, %v193_v0 }
 0x144   :  { %457 = vrsqrt.f32 %v197_v1 }
 0x14e   :  { %v458_v9 = vpop.eup %457 }
 0x14f   :  { %v201_v10 = vmul.f32 %v458_v9, %v195_v8 }
 0x151   :  { %v384_v12 = vmul.f32 -1.442695, %v201_v10 }
 0x153   :  { %459 = vpow2.f32 %v384_v12 }
 0x154   :  { %461 = vrsqrt.f32 %v196_v14 }
 0x15d   :  { %v460_v15 = vpop.eup %459 }
 0x15e   :  { %v205_v16 = vadd.f32 1.0, %v460_v15  ;;  %v462_v17 = vpop.eup %461 }
 0x15f   :  { %v200_v19 = vmul.f32 %v462_v17, %v194_v18 }
 0x160   :  { %463 = vrcp.f32 %v205_v16 }
 0x16a   :  { %v464_v20 = vpop.eup %463 }
 0x16b   :  { %v208_v21 = vmul.f32 %v464_v20, %v200_v19 }
 0x16d   :  { %v209_v22 = vadd.f32 %v208_v21, %v636_v49 }
 0x16f   :  { %v210_v23 = vmul.f32 0.70710677, %v209_v22 }
 0x171   :  { %308 = vmatmul.mubr.f32.vlgmr.msra.gmra.mrb[0].mxu1 %v210_v23 }
 0x244   :  { %v309_v24 = vpop.f32.mrb[0].mxu1 }
 0x245   :  { %v311_v25 = vpop.f32.mrb[1].mxu1  ;;  %v314_v28 = vrot.slane %v309_v24, 4  ;;  %v326_v29 = vmul.f32 %v309_v24, %v309_v24 }
 0x246   :  { %v320_v26 = vrot.slane %v311_v25, 4  ;;  %v327_v27 = vmul.f32 %v311_v25, %v311_v25 }
 0x247   :  { %v315_v35 = vadd.f32 %v314_v28, %v309_v24  ;;  %v328_v36 = vrot.slane %v326_v29, 4 }
 0x248   :  { %v321_v30 = vadd.f32 %v320_v26, %v311_v25  ;;  %v334_v31 = vrot.slane %v327_v27, 4 }
 0x249   :  { %v316_v40 = vrot.slane %v315_v35, 2  ;;  %v329_v49 = vadd.f32 %v328_v36, %v326_v29 }
 0x24a   :  { %v322_v32 = vrot.slane %v321_v30, 2  ;;  %v335_v33 = vadd.f32 %v334_v31, %v327_v27 }
 0x24b   :  { %v317_v45 = vadd.f32 %v316_v40, %v315_v35  ;;  %v330_v46 = vrot.slane %v329_v49, 2 }
 0x24c   :  { %v323_v34 = vadd.f32 %v322_v32, %v321_v30  ;;  %v336_v37 = vrot.slane %v335_v33, 2 }
 0x24d   :  { %v318_v51 = vrot.slane %v317_v45, 1  ;;  %v331_v52 = vadd.f32 %v330_v46, %v329_v49 }
 0x24e   :  { %v324_v38 = vrot.slane %v323_v34, 1  ;;  %v337_v39 = vadd.f32 %v336_v37, %v335_v33 }
 0x24f   :  { %v319_v55 = vadd.f32 %v318_v51, %v317_v45  ;;  %v332_v56 = vrot.slane %v331_v52, 1 }
 0x250   :  { %v325_v41 = vadd.f32 %v324_v38, %v323_v34  ;;  %v338_v42 = vrot.slane %v337_v39, 1 }
 0x251   :  { %v333_v57 = vadd.f32 %v332_v56, %v331_v52  ;;  %v340_v58 = vmul.f32 0.125, %v319_v55 }
 0x252   :  { %v339_v43 = vadd.f32 %v338_v42, %v337_v39  ;;  %v341_v44 = vmul.f32 0.125, %v325_v41 }
 0x253   :  { %v342_v59 = vmul.f32 0.125, %v333_v57  ;;  %v344_v60 = vmul.f32 %v340_v58, %v340_v58  ;;  %v350_v7 = vsub.f32 %v309_v24, %v340_v58 }
 0x254   :  { %v343_v47 = vmul.f32 0.125, %v339_v43  ;;  %v345_v48 = vmul.f32 %v341_v44, %v341_v44  ;;  %v351_v61 = vsub.f32 %v311_v25, %v341_v44 }
 0x255   :  { %v346_v0 = vsub.f32 %v342_v59, %v344_v60 }
 0x256   :  { %v347_v50 = vsub.f32 %v343_v47, %v345_v48 }
 0x257   :  { %v348_v2 = vmax.f32 %v346_v0, 0.0 }
 0x258   :  { %v349_v53 = vmax.f32 %v347_v50, 0.0 }
 0x259   :  { %v352_v3 = vadd.f32 1e-05, %v348_v2 }
 0x25a   :  { %v353_v54 = vadd.f32 1e-05, %v349_v53 }
 0x25c   :  { %465 = vrsqrt.f32 %v353_v54 }
 0x266   :  { %v466_v62 = vpop.eup %465 }
 0x267   :  { %v357_v63 = vmul.f32 %v466_v62, %v351_v61 }
 0x269   :  { %v385_v1 = vmul.f32 -1.442695, %v357_v63 }
 0x26b   :  { %467 = vpow2.f32 %v385_v1 }
 0x26c   :  { %469 = vrsqrt.f32 %v352_v3 }
 0x275   :  { %v468_v4 = vpop.eup %467 }
 0x276   :  { %v361_v5 = vadd.f32 1.0, %v468_v4  ;;  %v470_v6 = vpop.eup %469 }
 0x277   :  { %v356_v8 = vmul.f32 %v470_v6, %v350_v7 }
 0x278   :  { %471 = vrcp.f32 %v361_v5 }
 0x282   :  { %v472_v9 = vpop.eup %471 }
 0x283   :  { %v364_v10 = vmul.f32 %v472_v9, %v356_v8 }
 0x285   :  { %v365_v11 = vadd.f32 %v364_v10, %v210_v23 }
 0x287   :  { %v366_v12 = vmul.f32 0.70710677, %v365_v11 }
 0x289   :  { %367 = vst [vmem:[#allocation8] sm:$0xff] %v366_v12 }
 0x28a   :  { %550 = shalt.err (!%p547_p0)
}
 0x28b   :  { %s551_s25 = scalar_lea.hbm %s655_s3, 128 }
 0x28c   :  { %p552_p1 = scmp.ne.s32.totalorder %s655_s3, %s551_s25  ;;  %p555_p2 = scmp.lt.u32.totalorder %s551_s25, %s655_s3 }
 0x28e   :  { %p557_p3 = pnand %p555_p2, %p552_p1 }
 0x290   :  { %560 = shalt.err (!%p557_p3)
}
 0x291   :  { %377 = dma.vmem_to_hbm [thread:$0]  %s375_s21, 128, %s655_s3, [#allocation4]  }
 0x292   :  { %565 = dma.done.wait [#allocation4], 128  }
 0x293   :  { %566 = vsyncadd [#allocation4], 4294967168 }
 0x294   :  { %381 = vsyncpa [#allocation3], 1 }
 0x295   :  { %382 = vsyncpa [#allocation6], 1 }
 0x296   :  { %383 = vsyncpa [#allocation4], 1 }

</bundles_post_ra>
